<compile_context>
chip_gen: v6e
topology: v6e:2x2x1
jax: 0.10.0
libtpu: 0.0.40
codegen_flags: <defaults>
</compile_context>

<pallas_src>
import functools

import jax
import jax.numpy as jnp
from jax.experimental import pallas as pl
from jax.experimental.pallas import tpu as pltpu

# ----------------------- synthetic quantizer config -----------------------
BITS = 4
SIGNED = True
NARROW_RANGE = False
SCALE = 0.5  # quant_act_scale()

MIN_INT = float(-2 ** (BITS - 1) + int(NARROW_RANGE)) if SIGNED else 0.0
MAX_INT = float(MIN_INT + 2 ** BITS - int(NARROW_RANGE) - 1)


# ------------------------------ kernel -------------------------------------
def _quant_act_kernel(x_ref, gb_ref, o_ref, *, scale, min_int, max_int,
                      bin_out):
    # Quant scale is pre-folded into the per-row affine: g = gamma/s, b = beta/s.
    #   q = clamp(round(gamma*x/s + beta/s), min_int, max_int)
    x = x_ref[...].astype(jnp.float32)          # [rt, lt] (compute in f32)
    g = gb_ref[:, 0:1]                          # [rt, 1]
    b = gb_ref[:, 1:2]                          # [rt, 1]
    q = jnp.clip(jnp.round(x * g + b), min_int, max_int)
    if bin_out:
        # Integer quant codes (4-bit values fit in int8).
        o_ref[...] = q.astype(jnp.int8)
    else:
        # Fake-quantized output: q * s, cast back to the activation dtype.
        o_ref[...] = (q * scale).astype(o_ref.dtype)


# --------------------------- tiling helpers ---------------------------------
def _cdiv(a, b):
    return -(-a // b)


def _round_up(n, m):
    return ((n + m - 1) // m) * m


def _round_down(n, m):
    return (n // m) * m


def _sublane_quantum(itemsize):
    # Native sublane tiling: f32 -> 8, bf16 -> 16, int8 -> 32.
    return {4: 8, 2: 16, 1: 32}.get(int(itemsize), 8)


def _device_budgets():
    """(target bytes for the x block, scoped-VMEM cap) per TPU generation."""
    kind = ""
    try:
        kind = jax.devices()[0].device_kind.lower()
    except Exception:
        pass
    if "v7" in kind:
        return 4 << 20, 32 << 20      # v7x: 64 MiB physical VMEM -> stay <= 32 MiB
    if "v5" in kind or "v6" in kind:
        return 8 << 20, 64 << 20      # 128 MiB physical -> raise scoped limit
    return 4 << 20, 32 << 20          # unknown: conservative


def _choose_tiles(R, L, row_quantum, in_bytes, out_bytes, target_block_bytes,
                  vmem_cap, min_blocks=2):
    """Pick (row_tile, lane_tile): lane-dense blocks filling the block budget,
    fitting the scoped-VMEM cap, with >= min_blocks grid steps."""
    # Lane tile: cover L (rounded to 128) unless the budget at the minimum row
    # quantum is smaller; the ragged last block is handled by store masking.
    if L <= 128:
        lane_tile = L
    else:
        lane_cap = max(128, _round_down(
            target_block_bytes // (row_quantum * in_bytes), 128))
        lane_tile = min(_round_up(L, 128), lane_cap)

    # Row tile: grow to fill the block budget.
    if R <= row_quantum:
        row_tile = R
    else:
        rows_budget = max(row_quantum,
                          target_block_bytes // (lane_tile * in_bytes))
        row_tile = min(_round_up(R, row_quantum),
                       _round_up(rows_budget, row_quantum))

    # Double-buffered in/out/affine tiles must fit the scoped-VMEM cap; the
    # [row_tile, 2] affine block is lane-padded to 128 lanes in VMEM.
    def vmem_need(rt, lt):
        return 2 * (rt * lt * in_bytes + rt * lt * out_bytes + rt * 128 * 4)

    while vmem_need(row_tile, lane_tile) > vmem_cap - (2 << 20):
        if row_tile > row_quantum:
            row_tile = max(row_quantum, _round_down(row_tile // 2, row_quantum))
        elif lane_tile > 128:
            lane_tile = max(128, _round_down(lane_tile // 2, 128))
        else:
            break

    # Ensure >= min_blocks so v7x's two TensorCores both get blocks
    # (prefer shrinking rows to keep the output lane-dense).
    while _cdiv(R, row_tile) * _cdiv(L, lane_tile) < min_blocks:
        if row_tile > row_quantum:
            row_tile = max(row_quantum, _round_down(row_tile // 2, row_quantum))
        elif lane_tile > 128:
            lane_tile = max(128, _round_down(lane_tile // 2, 128))
        else:
            break

    return row_tile, lane_tile


# ------------------------------ wrapper ------------------------------------
def quant_brevitas_activation(x_nchw, gamma, beta, *, bin_output=False):
    """x_nchw: [B, C, H, W] float. gamma/beta: [C] float (folded BatchNorm)."""
    B, C, H, W = x_nchw.shape
    R, L = B * C, H * W

    # Native-layout 2-D view (free reshape): row = b*C + c, lane = h*W + w.
    x2d = x_nchw.reshape(R, L)
    in_dtype = x2d.dtype
    out_dtype = jnp.int8 if bin_output else in_dtype
    in_bytes = jnp.dtype(in_dtype).itemsize
    out_bytes = jnp.dtype(out_dtype).itemsize

    # Fold the quant scale into the per-channel affine and pack gamma/beta into
    # a single [R, 2] side input (one DMA stream / one lane-padded VMEM buffer).
    gb = jnp.stack([gamma.astype(jnp.float32) / SCALE,
                    beta.astype(jnp.float32) / SCALE], axis=-1)      # [C, 2]
    gb_rows = jnp.tile(gb, (B, 1))                                   # [R, 2]

    row_quantum = max(_sublane_quantum(in_bytes), _sublane_quantum(out_bytes))
    target_bytes, vmem_cap = _device_budgets()
    row_tile, lane_tile = _choose_tiles(R, L, row_quantum, in_bytes, out_bytes,
                                        target_bytes, vmem_cap)
    grid = (_cdiv(R, row_tile), _cdiv(L, lane_tile))

    kern = functools.partial(_quant_act_kernel, scale=SCALE, min_int=MIN_INT,
                             max_int=MAX_INT, bin_out=bin_output)

    n = R * L
    cost = pl.CostEstimate(
        flops=6 * n,
        transcendentals=0,
        bytes_accessed=n * in_bytes + n * out_bytes + R * 2 * 4)

    out2d = pl.pallas_call(
        kern,
        out_shape=jax.ShapeDtypeStruct((R, L), out_dtype),
        grid_spec=pltpu.PrefetchScalarGridSpec(
            num_scalar_prefetch=0,
            grid=grid,
            in_specs=[
                pl.BlockSpec((row_tile, lane_tile), lambda i, j: (i, j)),
                pl.BlockSpec((row_tile, 2), lambda i, j: (i, 0)),
            ],
            out_specs=pl.BlockSpec((row_tile, lane_tile), lambda i, j: (i, j)),
        ),
        compiler_params=pltpu.CompilerParams(
            dimension_semantics=("parallel", "parallel"),
            vmem_limit_bytes=int(vmem_cap)),
        cost_estimate=cost,
    )(x2d, gb_rows)

    return out2d.reshape(B, C, H, W)


# ------------------------------ reference ----------------------------------
def _reference(x_nchw, gamma, beta, bin_output=False):
    xf = x_nchw.astype(jnp.float32)
    g = gamma.astype(jnp.float32).reshape(1, -1, 1, 1)
    b = beta.astype(jnp.float32).reshape(1, -1, 1, 1)
    y = xf * g + b
    q = jnp.clip(jnp.round(y / SCALE), MIN_INT, MAX_INT)
    if bin_output:
        return q.astype(jnp.int8)
    return (q * SCALE).astype(x_nchw.dtype)


# ------------------------------ main ----------------------------------------
if __name__ == "__main__":
    key = jax.random.PRNGKey(0)
    k0, k1, k2 = jax.random.split(key, 3)

    # ---- primary test: f32, divisible shapes --------------------------------
    B, C, H, W = 2, 4, 16, 16
    x = jax.random.normal(k0, (B, C, H, W), dtype=jnp.float32) * 2.0
    gamma = 1.0 + 0.1 * jnp.arange(C, dtype=jnp.float32)
    beta = 0.01 * jnp.arange(C, dtype=jnp.float32)

    y = jax.block_until_ready(
        quant_brevitas_activation(x, gamma, beta, bin_output=False))
    y_ref = _reference(x, gamma, beta, bin_output=False)
    assert y.shape == (B, C, H, W) and y.dtype == jnp.float32
    assert jnp.allclose(y, y_ref, atol=1e-6), "float-output mismatch"

    yb = jax.block_until_ready(
        quant_brevitas_activation(x, gamma, beta, bin_output=True))
    yb_ref = _reference(x, gamma, beta, bin_output=True)
    assert yb.shape == (B, C, H, W) and yb.dtype == jnp.int8
    assert jnp.array_equal(yb, yb_ref), "bin-output mismatch"

    # ---- ragged shapes: exercises cdiv grid + masked last block -------------
    B2, C2, H2, W2 = 2, 3, 15, 15
    x2 = jax.random.normal(k1, (B2, C2, H2, W2), dtype=jnp.float32) * 2.0
    g2 = 1.0 + 0.1 * jnp.arange(C2, dtype=jnp.float32)
    b2 = 0.01 * jnp.arange(C2, dtype=jnp.float32)
    y2 = jax.block_until_ready(
        quant_brevitas_activation(x2, g2, b2, bin_output=False))
    assert jnp.allclose(y2, _reference(x2, g2, b2), atol=1e-6), \
        "ragged-shape mismatch"

    # ---- bf16 I/O: dtype-aware tiling, f32 math, cast on store --------------
    B3, C3, H3, W3 = 4, 8, 16, 16
    x3 = (jax.random.normal(k2, (B3, C3, H3, W3), dtype=jnp.float32)
          * 2.0).astype(jnp.bfloat16)
    g3 = 1.0 + 0.1 * jnp.arange(C3, dtype=jnp.float32)
    b3 = 0.01 * jnp.arange(C3, dtype=jnp.float32)
    y3 = jax.block_until_ready(
        quant_brevitas_activation(x3, g3, b3, bin_output=False))
    assert y3.dtype == jnp.bfloat16
    assert jnp.allclose(y3.astype(jnp.float32),
                        _reference(x3, g3, b3).astype(jnp.float32),
                        atol=1e-6), "bf16 mismatch"

    print("KERNEL_OK")
</pallas_src>

<mosaic_0001>
module attributes {stable_mosaic.version = 11 : i64} {
  func.func @_quant_act_kernel(%arg0: i32, %arg1: i32, %arg2: memref<8x128xf32, #tpu.memory_space<vmem>>, %arg3: memref<8x2xf32, #tpu.memory_space<vmem>>, %arg4: memref<8x128xf32, #tpu.memory_space<vmem>>) attributes {dimension_semantics = [#tpu.dimension_semantics<parallel>, #tpu.dimension_semantics<parallel>], iteration_bounds = array<i64: 1, 2>, scalar_prefetch = 0 : i64, scratch_operands = 0 : i64, tpu.core_type = #tpu.core_type<tc>, window_params = [{transform_indices = @transform_0, window_bounds = array<i64: 8, 128>}, {transform_indices = @transform_1, window_bounds = array<i64: 8, 2>}, {transform_indices = @transform_2, window_bounds = array<i64: 8, 128>}]} {
    %c0 = arith.constant 0 : index
    %c0_0 = arith.constant 0 : index
    %0 = vector.load %arg2[%c0, %c0_0] : memref<8x128xf32, #tpu.memory_space<vmem>>, vector<8x128xf32>
    %c0_1 = arith.constant 0 : index
    %c0_2 = arith.constant 0 : index
    %1 = vector.load %arg3[%c0_1, %c0_2] : memref<8x2xf32, #tpu.memory_space<vmem>>, vector<8x1xf32>
    %c0_3 = arith.constant 0 : index
    %c1 = arith.constant 1 : index
    %2 = vector.load %arg3[%c0_3, %c1] : memref<8x2xf32, #tpu.memory_space<vmem>>, vector<8x1xf32>
    %3 = vector.broadcast %1 : vector<8x1xf32> to vector<8x128xf32>
    %4 = arith.mulf %0, %3 : vector<8x128xf32>
    %5 = vector.broadcast %2 : vector<8x1xf32> to vector<8x128xf32>
    %6 = arith.addf %4, %5 : vector<8x128xf32>
    %7 = math.roundeven %6 : vector<8x128xf32>
    %cst = arith.constant -8.000000e+00 : f32
    %cst_4 = arith.constant 7.000000e+00 : f32
    %8 = vector.broadcast %cst : f32 to vector<8x128xf32>
    %9 = arith.maximumf %8, %7 : vector<8x128xf32>
    %10 = vector.broadcast %cst_4 : f32 to vector<8x128xf32>
    %11 = arith.minimumf %10, %9 : vector<8x128xf32>
    %cst_5 = arith.constant 5.000000e-01 : f32
    %12 = vector.broadcast %cst_5 : f32 to vector<8x128xf32>
    %13 = arith.mulf %11, %12 : vector<8x128xf32>
    %c0_6 = arith.constant 0 : index
    %c0_7 = arith.constant 0 : index
    %14 = vector.load %arg4[%c0_6, %c0_7] : memref<8x128xf32, #tpu.memory_space<vmem>>, vector<8x128xf32>
    tpu.vector_store %arg4[%c0_6, %c0_7], %13 {strides = array<i32>} : memref<8x128xf32, #tpu.memory_space<vmem>>, vector<8x128xf32>,
    return
  }
  func.func @transform_0(%arg0: i32, %arg1: i32) -> (i32, i32) {
    %c0_i32 = arith.constant 0 : i32
    return %arg0, %arg1 : i32, i32
  }
  func.func @transform_1(%arg0: i32, %arg1: i32) -> (i32, i32) {
    %c0_i32 = arith.constant 0 : i32
    %c0_i32_0 = arith.constant 0 : i32
    return %arg0, %c0_i32 : i32, i32
  }
  func.func @transform_2(%arg0: i32, %arg1: i32) -> (i32, i32) {
    %c0_i32 = arith.constant 0 : i32
    return %arg0, %arg1 : i32, i32
  }
}

</mosaic_0001>

<bundles_post_ra>
// kernel: tpu_custom_call.1
= control target key start
LH: loop header
LB: loop body
LE: loop exit
PB: predicated region body
PF: predicated region fallthrough
CT: control target
= control target key end

     0   :  { %7 = vsyncpa [#allocation3], 0  ;;  %s679_s0 = inlined_call_operand.hbm [shape: f32[8,256], index: 0, kind: input, shape index: {}]   ;;  %s680_s1 = inlined_call_operand.vmem [shape: f32[8,2], index: 1, kind: input, shape index: {}]   ;;  %s681_s2 = inlined_call_operand.hbm [shape: f32[8,256], index: 2, kind: output, shape index: {}]  }
   0x1   :  { %9 = vsyncpa [#allocation3 + $0x1], 0 }
   0x2   :  { %10 = vsyncpa [#allocation4], 0 }
   0x3   :  { %12 = vsyncpa [#allocation4 + $0x1], 0  ;;  %s542_s9 = smov 0   ;;  %s544_s10 = smov 0  }
   0x4   :  { %s546_s11 = smov 0   ;;  %s548_s12 = smov 0  }
   0x5   :  { %s550_s13 = smov 0   ;;  %s552_s14 = smov 0  }
   0x6 LB: > { %s325_s15 = sadd.s32 4294967295, %s521_s14   ;;  %s326_s16 = sadd.s32 4294967294, %s521_s14   ;;  %s521_s14 = sphi %s552_s14, %s18_s14   ;;  %s517_s13 = sphi %s550_s13, %s693_s13   ;;  %s513_s12 = sphi %s548_s12, %s692_s12   ;;  %s509_s11 = sphi %s546_s11, %s691_s11   ;;  %s505_s10 = sphi %s544_s10, %s690_s10   ;;  %s501_s9 = sphi %s542_s9, %s689_s9  }
   0x7   : > { %s27_s17 = sadd.s32 1, %s517_s13  ;;  %s39_s18 = sadd.s32 1, %s509_s11 }
   0x8   : > { %p28_p0 = scmp.ge.s32.totalorder %s27_s17, 2  ;;  %p46_p1 = scmp.ne.s32.totalorder %s509_s11, %s505_s10 }
   0x9   : > { %p47_p2 = scmp.eq.s32.totalorder %s521_s14, 0  ;;  %p52_p3 = scmp.ne.s32.totalorder %s505_s10, %s501_s9 }
   0xa   : > { %s695_s17 = smov (%p28_p0, %s27_s17), 0  ;;  %p53_p5 = scmp.eq.s32.totalorder %s325_s15, 0 }
   0xb   : > { %p583_p4 = por %p47_p2, %p46_p1  ;;  %s35_s20 = ssub.s32 %s517_s13, %s695_s17 }
   0xc   : > { %p104_p6 = scmp.eq.s32.totalorder %s325_s15, 1  ;;  %p37_p7 = scmp.eq.s32.totalorder %s35_s20, 0 }
   0xd   : > { %p589_p8 = por %p53_p5, %p52_p3  ;;  %p110_p10 = scmp.eq.s32.totalorder %s326_s16, 1 }
   0xe   : > { %p593_p9 = por %p104_p6, %p46_p1  ;;  %p359_p13 = scmp.lt.s32.totalorder %s521_s14, 2 }
   0xf   : > { %s598_s23 = scalar_select %p37_p7, %s509_s11, %s39_s18  }
  0x10   : > { %p600_p11 = por %p110_p10, %p52_p3  ;;  %s137_s25 = sand.u32 1, %s509_s11  }
  0x11   : > { %s330_s26 = sshll.u32 %s137_s25, 3  ;;  %s331_s27 = sshll.u32 %s517_s13, 7 }
  0x12   : > { %s685_s24 = scalar_select %p600_p11, 1, 0 }
  0x13   : > { %s148_s30 = scalar_lea.hbm %s679_s0, %s331_s27  ;;  %s141_s3 = scalar_lea.vmem [#allocation2], %s330_s26 }
  0x14   : > { %s150_s4 = sshll.u32 %s141_s3, 4  ;;  %p613_p0 = pnand %p359_p13, %p583_p4  ;;  %s151_s4 = int_to_ptr.vmem [resolvable:$true] %s150_s4 }
  0x15   : > { %p332_p1 = scmp.ge.s32.totalorder %s521_s14, 1  ;;  %p155_p2 = scmp.lt.s32.totalorder %s521_s14, 3 }
  0x16   : > { %s138_s6 = scalar_lea.sflag [#allocation3], %s137_s25  ;;  %p415_p3 = pneg %p613_p0 }
  0x17   : > { %s426_s7 = scalar_lea.vmem %s151_s4, 128  ;;  %s523_s8 = smov [#allocation2]  }
  0x18   : > { %p427_p5 = scmp.ne.s32.totalorder %s151_s4, %s426_s7  ;;  %s431_s15 = sshll.u32 %s523_s8, 4  ;;  %s432_s15 = int_to_ptr.vmem [resolvable:$false] %s431_s15 }
  0x19   : > { %s433_s16 = scalar_lea.vmem %s432_s15, 256  ;;  %p434_p10 = scmp.lt.s32.totalorder %s151_s4, %s432_s15 }
  0x1a   : > { %p429_p6 = pnand %p427_p5, %p415_p3  ;;  %p435_p12 = scmp.lt.s32.totalorder %s433_s16, %s426_s7 }
  0x1c   : > { %p430_p7 = pneg %p429_p6  ;;  %p436_p4 = por %p435_p12, %p434_p10 }
  0x1e   : > { %p437_p13 = pnand %p436_p4, %p430_p7 }
  0x20   : > { %440 = shalt.err (!%p437_p13)
}
  0x21   : > { %354 = dma.hbm_to_vmem [thread:$0]  (!%p613_p0), %s148_s30, 128, %s151_s4, %s138_s6  }
  0x22   : > { %p156_p11 = pnand %p332_p1, %p155_p2 }
  0x23   : > { %s628_s18 = sand.u32 (!%p156_p11), 1, %s505_s10  }
  0x24   : > { %159 = sbr.rel (%p156_p11) target bundleno = 203 (0xcb), region = 28  ;;  %s333_s19 = sshll.u32 (!%p156_p11), %s628_s18, 3 }
  0x25   : > { %s162_s20 = scalar_lea.sflag (!%p156_p11), [#allocation3], %s628_s18  ;;  %s165_s25 = scalar_lea.vmem (!%p156_p11), [#allocation2], %s333_s19 }
  0x29   : > { %492 = dma.done.wait (%p589_p8), %s162_s20, 128  }
  0x2a   : > { %494 = vsyncadd (%p589_p8), %s162_s20, 4294967168  ;;  %v524_v0 = vmov 0   ;;  %v195_v1 = vld [vmem:[%s680_s1] sm:$0xff]  ;;  %v525_v2 = vmov 1   ;;  %s336_s21 = sshll.u32 %s513_s12, 7  ;;  %s189_s28 = scalar_lea.vmem [#allocation5], %s333_s19 }
  0x2b   : > { %411 = vset.pattern.permute.xlu0 %v524_v0  ;;  %v194_v4 = vld [vmem:[%s165_s25] sm:$0xff]  ;;  %s228_s29 = sshll.u32 %s189_s28, 4  ;;  %s226_s4 = scalar_lea.hbm %s681_s2, %s336_s21  ;;  %s229_s29 = int_to_ptr.vmem [resolvable:$true] %s228_s29 }
  0x2c   : > { %198 = vperm.xlu0 %411, %v195_v1   ;;  %s213_s5 = scalar_lea.sflag [#allocation4], %s628_s18  ;;  %s441_s6 = scalar_lea.vmem %s229_s29, 128 }
  0x2d   : > { %p442_p8 = scmp.ne.s32.totalorder %s229_s29, %s441_s6  ;;  %s526_s7 = smov [#allocation5]  }
  0x2e   : > { %s445_s8 = sshll.u32 %s526_s7, 4  ;;  %s446_s8 = int_to_ptr.vmem [resolvable:$false] %s445_s8 }
  0x2f   : > { %p443_p11 = pnand %p442_p8, %p593_p9  ;;  %s447_s12 = scalar_lea.vmem %s446_s8, 256 }
  0x30   : > { %412 = vset.pattern.permute.xlu0 %v525_v2  ;;  %p448_p0 = scmp.lt.s32.totalorder %s229_s29, %s446_s8  ;;  %p449_p1 = scmp.lt.s32.totalorder %s447_s12, %s441_s6 }
  0x31   : > { %203 = vperm.xlu0 %412, %v195_v1   ;;  %p444_p12 = pneg %p443_p11 }
  0x32   : > { %p450_p2 = por %p449_p1, %p448_p0 }
  0x34   : > { %p451_p3 = pnand %p450_p2, %p444_p12 }
  0xa7   : > { %v199_v3 = vpop.permute.xlu0 %198 }
  0xa8   : > { %v201_v5 = vmul.f32 %v199_v3, %v194_v4 }
  0xac   : > { %v204_v6 = vpop.permute.xlu0 %203 }
  0xad   : > { %v206_v7 = vadd.f32 %v204_v6, %v201_v5 }
  0xaf   : > { %v341_v8 = vcvt.f32.s32 %v206_v7  ;;  %v339_v10 = vand.u32 2147483647, %v206_v7  ;;  %v344_v12 = vand.u32 2147483648, %v206_v7 }
  0xb1   : > { %v342_v9 = vcvt.s32.f32 %v341_v8  ;;  %vm340_vm0 = vcmp.lt.f32.partialorder %v339_v10, 8388608.0 }
  0xb3   : > { %v343_v11 = vand.u32 2147483647, %v342_v9 }
  0xb5   : > { %v345_v13 = vor.u32 %v344_v12, %v343_v11 }
  0xb7   : > { %v346_v14 = vsel %vm340_vm0, %v345_v13, %v206_v7 }
  0xb8   : > { %v208_v15 = vmax.f32 %v346_v14, -8.0 }
  0xba   : > { %v209_v16 = vmin.f32 %v208_v15, 7.0 }
  0xbc   : > { %v210_v17 = vmul.f32 0.5, %v209_v16 }
  0xbe   : > { %211 = vst [vmem:[%s189_s28] sm:$0xff] %v210_v17 }
  0xbf   : > { %454 = shalt.err (!%p451_p3)
}
  0xc0   : > { %s455_s15 = scalar_lea.hbm %s226_s4, 128  ;;  %s459_s19 = scalar_lea.hbm %s681_s2, 256 }
  0xc1   : > { %p456_p5 = scmp.ne.s32.totalorder %s226_s4, %s455_s15  ;;  %p460_p10 = scmp.lt.s32.totalorder %s226_s4, %s681_s2 }
  0xc2   : > { %p461_p4 = scmp.lt.s32.totalorder %s459_s19, %s455_s15 }
  0xc3   : > { %p457_p6 = pnand %p456_p5, %p593_p9 }
  0xc4   : > { %p462_p13 = por %p461_p4, %p460_p10 }
  0xc5   : > { %p458_p7 = pneg %p457_p6 }
  0xc7   : > { %p463_p8 = pnand %p462_p13, %p458_p7 }
  0xc9   : > { %466 = shalt.err (!%p463_p8)
}
  0xca   : > { %349 = dma.vmem_to_hbm [thread:$0]  (%p593_p9), %s229_s29, 128, %s226_s4, %s213_s5  }
  0xcb PF: > { %s240_s26 = sand.u32 1, %s501_s9   ;;  %p687_p11 = scmp.ne.s32.totalorder %s685_s24, 0 }
  0xcc   : > { %p688_p12 = scmp.ge.s32.totalorder %s521_s14, 2  ;;  %s241_s27 = scalar_lea.sflag [#allocation4], %s240_s26 }
  0xce   : > { %p356_p0 = pnand %p688_p12, %p687_p11 }
  0xd0   : > { %p357_p1 = pneg %p356_p0 }
  0xd2   : > { %496 = dma.done.wait (%p357_p1), %s241_s27, 128  }
  0xd3   : > { %498 = vsyncadd (%p357_p1), %s241_s27, 4294967168  ;;  %s18_s14 = sadd.s32 1, %s521_s14   ;;  %s689_s9 = smov %s505_s10 }
  0xd4   : > { %p15_p2 = scmp.ge.s32.totalorder %s18_s14, 4   ;;  %s690_s10 = smov %s509_s11 }
  0xd5   : > { %s691_s11 = smov %s598_s23  ;;  %s692_s12 = smov %s517_s13 }
  0xd6   : > { %s693_s13 = smov %s695_s17  ;;  %17 = sbr.rel (!%p15_p2) target bundleno = 6 (0x6), region = 76 }
  0xdb   :  { %246 = vsyncpa [#allocation3], 1 }
  0xdc   :  { %248 = vsyncpa [#allocation3 + $0x1], 1 }
  0xdd   :  { %249 = vsyncpa [#allocation4], 1 }
  0xde   :  { %251 = vsyncpa [#allocation4 + $0x1], 1 }

</bundles_post_ra>
